<compile_context>
chip_gen: v7x
topology: tpu7x:2x2x1
jax: 0.10.0
libtpu: 0.0.40
codegen_flags: <defaults>
</compile_context>

<pallas_src>
import functools

import jax
import jax.numpy as jnp
from jax import lax
from jax.experimental import pallas as pl
from jax.experimental.pallas import tpu as pltpu


def _matching_tensor_kernel(x_ref, mw_ref, y_ref, o_ref, *,
                            channels, dim, normalize, eps):
    # x_ref : (1, tL, D)     left-sequence tile for batch b
    # mw_ref: (D, C*D)       interaction matrix, (C,D,E)->(D,C*E), VMEM-resident
    # y_ref : (1, R, D)      right sequence for batch b
    # o_ref : (1, C, tL, R)  output tile, already in the final BCLR layout
    x = x_ref[0]                      # (tL, D), native dtype
    y = y_ref[0]                      # (R, D),  native dtype

    if normalize:
        # F.normalize(p=2, dim=-1): v / max(||v||_2, eps)
        #   == v * min(rsqrt(sum(v^2)), 1/eps)   (exact, incl. the zero-row case)
        inv_cap = jnp.float32(1.0 / eps)
        xf = x.astype(jnp.float32)
        yf = y.astype(jnp.float32)
        x_inv = jnp.minimum(lax.rsqrt(jnp.sum(xf * xf, axis=-1, keepdims=True)),
                            inv_cap)
        y_inv = jnp.minimum(lax.rsqrt(jnp.sum(yf * yf, axis=-1, keepdims=True)),
                            inv_cap)
        x = (xf * x_inv).astype(x.dtype)
        y = (yf * y_inv).astype(y.dtype)

    # Fused first contraction over d for ALL channels at once (one wide MXU op):
    #   xm_wide[l, c*D + e] = sum_d x[l, d] * M[c, d, e]
    xm_wide = jnp.dot(x, mw_ref[...],
                      preferred_element_type=jnp.float32)         # (tL, C*D) f32
    # Keep the second contraction on the native-dtype MXU fast path
    # (bf16 in -> bf16 operands, f32 accumulation). No-op for f32 inputs.
    xm = xm_wide.astype(x.dtype)

    # Hoist ONE transpose of y out of the channel loop so every channel is a
    # plain (tL, D) @ (D, R) matmul (no per-channel XLU relayout of y).
    y_t = y.T                                                     # (D, R)

    for c in range(channels):
        xm_c = xm[:, c * dim:(c + 1) * dim]                       # (tL, D)
        o_ref[0, c] = jnp.dot(
            xm_c, y_t, preferred_element_type=jnp.float32
        ).astype(o_ref.dtype)                                     # (tL, R)


def _pick_l_tile(L, target=512):
    """Largest 8-aligned tile <= target that divides L; L itself if small."""
    if L <= target:
        return L
    for t in range(target, 7, -8):
        if L % t == 0:
            return t
    # No clean divisor: rely on Pallas edge-block masking (compute is strictly
    # row-independent, so padded rows never contaminate valid output rows).
    return target


def _build_call(B, L, R, D, C, tL, dtype, normalize, eps, single_buffer_m):
    kernel = functools.partial(
        _matching_tensor_kernel, channels=C, dim=D, normalize=normalize, eps=eps
    )
    m_spec_kwargs = {}
    if single_buffer_m:
        # The constant-index M block never changes -> one VMEM buffer suffices.
        m_spec_kwargs["pipeline_mode"] = pl.Buffered(1)
    return pl.pallas_call(
        kernel,
        out_shape=jax.ShapeDtypeStruct((B, C, L, R), dtype),
        grid_spec=pltpu.PrefetchScalarGridSpec(
            num_scalar_prefetch=0,
            grid=(B, pl.cdiv(L, tL)),
            in_specs=[
                pl.BlockSpec((1, tL, D), lambda b, l: (b, l, 0)),
                # Constant block index -> fetched once, stays resident in VMEM.
                pl.BlockSpec((D, C * D), lambda b, l: (0, 0), **m_spec_kwargs),
                pl.BlockSpec((1, R, D), lambda b, l: (b, 0, 0)),
            ],
            out_specs=pl.BlockSpec((1, C, tL, R), lambda b, l: (b, 0, l, 0)),
        ),
        compiler_params=pltpu.CompilerParams(
            # Both axes independent -> shards across both TensorCores on v7x
            # even for small / odd B.
            dimension_semantics=("parallel", "parallel"),
            # NOTE: on v6e/v5e (128 MiB VMEM) sweep l_tile upward and raise
            # vmem_limit_bytes; do NOT copy that setting to v7x (64 MiB).
        ),
    )


def matching_tensor_forward(x, y, interaction_matrix, *,
                            normalize=True, eps=1e-12, l_tile=512):
    """x: (B, L, D), y: (B, R, D), interaction_matrix: (C, D, D) -> (B, C, L, R)."""
    B, L, D = x.shape
    _, R, _ = y.shape
    C = interaction_matrix.shape[0]

    # (C, D, E) -> (D, C*E): the first contraction becomes a single wide matmul.
    # Cast to the activation dtype so bf16 callers keep the MXU at native rate
    # (f32 callers keep full precision; pass bf16 activations for max MXU rate).
    m_wide = (jnp.transpose(interaction_matrix, (1, 0, 2))
              .reshape(D, C * D).astype(x.dtype))

    tL = _pick_l_tile(L, l_tile)

    try:
        call = _build_call(B, L, R, D, C, tL, x.dtype, normalize, eps,
                           single_buffer_m=True)
        return call(x, m_wide, y)
    except Exception:
        # pipeline_mode=pl.Buffered(1) is a VMEM-only optimization; fall back
        # cleanly if this JAX version rejects single-buffered BlockSpecs.
        call = _build_call(B, L, R, D, C, tL, x.dtype, normalize, eps,
                           single_buffer_m=False)
        return call(x, m_wide, y)


def init_interaction_matrix(key, matching_dim, channels, init_diag=True):
    """Deterministic re-creation of the module's __init__ parameter."""
    if init_diag:
        m = jax.random.uniform(
            key, (channels, matching_dim, matching_dim),
            minval=-0.05, maxval=0.05, dtype=jnp.float32,
        )
        eye = jnp.eye(matching_dim, dtype=jnp.float32)[None, :, :]
        m = m * (1.0 - eye) + 0.1 * eye   # fill_diagonal_(0.1) per channel
    else:
        m = jax.random.uniform(
            key, (channels, matching_dim, matching_dim),
            minval=0.0, maxval=1.0, dtype=jnp.float32,
        )
    return m


if __name__ == "__main__":
    key = jax.random.PRNGKey(0)
    k_m, k_x, k_y = jax.random.split(key, 3)

    B, L, R, D, C = 2, 8, 8, 32, 4  # batch, left seq, right seq, matching_dim, channels

    interaction_matrix = init_interaction_matrix(k_m, D, C, init_diag=True)
    x = jax.random.normal(k_x, (B, L, D), dtype=jnp.float32)
    y = jax.random.normal(k_y, (B, R, D), dtype=jnp.float32)

    out = matching_tensor_forward(x, y, interaction_matrix, normalize=True)
    out = jax.block_until_ready(out)

    # Reference check in plain JAX (same semantics as the PyTorch forward).
    xn = x / jnp.maximum(jnp.linalg.norm(x, axis=-1, keepdims=True), 1e-12)
    yn = y / jnp.maximum(jnp.linalg.norm(y, axis=-1, keepdims=True), 1e-12)
    ref = jnp.einsum("bld,cde,bre->bclr", xn, interaction_matrix, yn)
    assert out.shape == (B, C, L, R)
    assert jnp.allclose(out, ref, atol=1e-5, rtol=1e-5)

    print("KERNEL_OK")
</pallas_src>

<mosaic_0001>
module attributes {stable_mosaic.version = 11 : i64} {
  func.func @_matching_tensor_kernel(%arg0: i32, %arg1: i32, %arg2: memref<1x8x32xf32, #tpu.memory_space<vmem>>, %arg3: memref<32x128xf32, #tpu.memory_space<vmem>>, %arg4: memref<1x8x32xf32, #tpu.memory_space<vmem>>, %arg5: memref<1x4x8x8xf32, #tpu.memory_space<vmem>>) attributes {dimension_semantics = [#tpu.dimension_semantics<parallel>, #tpu.dimension_semantics<parallel>], iteration_bounds = array<i64: 2, 1>, scalar_prefetch = 0 : i64, scratch_operands = 0 : i64, tpu.core_type = #tpu.core_type<tc>, window_params = [{transform_indices = @transform_0, window_bounds = array<i64: 1, 8, 32>}, {pipeline_mode = #tpu.pipeline_mode<synchronous>, transform_indices = @transform_1, window_bounds = array<i64: 32, 128>}, {transform_indices = @transform_2, window_bounds = array<i64: 1, 8, 32>}, {transform_indices = @transform_3, window_bounds = array<i64: 1, 4, 8, 8>}]} {
    %c0 = arith.constant 0 : index
    %c0_0 = arith.constant 0 : index
    %c0_1 = arith.constant 0 : index
    %0 = vector.load %arg2[%c0, %c0_0, %c0_1] : memref<1x8x32xf32, #tpu.memory_space<vmem>>, vector<1x8x32xf32>
    %1 = vector.shape_cast %0 : vector<1x8x32xf32> to vector<8x32xf32>
    %c0_2 = arith.constant 0 : index
    %c0_3 = arith.constant 0 : index
    %c0_4 = arith.constant 0 : index
    %2 = vector.load %arg4[%c0_2, %c0_3, %c0_4] : memref<1x8x32xf32, #tpu.memory_space<vmem>>, vector<1x8x32xf32>
    %3 = vector.shape_cast %2 : vector<1x8x32xf32> to vector<8x32xf32>
    %4 = arith.mulf %1, %1 : vector<8x32xf32>
    %cst = arith.constant dense<0.000000e+00> : vector<8xf32>
    %5 = vector.multi_reduction <add>, %4, %cst [1] : vector<8x32xf32> to vector<8xf32>
    %6 = vector.shape_cast %5 : vector<8xf32> to vector<8x1xf32>
    %7 = math.rsqrt %6 : vector<8x1xf32>
    %cst_5 = arith.constant 9.99999995E+11 : f32
    %8 = vector.broadcast %cst_5 : f32 to vector<8x1xf32>
    %9 = arith.minimumf %7, %8 : vector<8x1xf32>
    %10 = arith.mulf %3, %3 : vector<8x32xf32>
    %cst_6 = arith.constant dense<0.000000e+00> : vector<8xf32>
    %11 = vector.multi_reduction <add>, %10, %cst_6 [1] : vector<8x32xf32> to vector<8xf32>
    %12 = vector.shape_cast %11 : vector<8xf32> to vector<8x1xf32>
    %13 = math.rsqrt %12 : vector<8x1xf32>
    %cst_7 = arith.constant 9.99999995E+11 : f32
    %14 = vector.broadcast %cst_7 : f32 to vector<8x1xf32>
    %15 = arith.minimumf %13, %14 : vector<8x1xf32>
    %16 = vector.broadcast %9 : vector<8x1xf32> to vector<8x32xf32>
    %17 = arith.mulf %1, %16 : vector<8x32xf32>
    %18 = vector.broadcast %15 : vector<8x1xf32> to vector<8x32xf32>
    %19 = arith.mulf %3, %18 : vector<8x32xf32>
    %c0_8 = arith.constant 0 : index
    %c0_9 = arith.constant 0 : index
    %20 = vector.load %arg3[%c0_8, %c0_9] : memref<32x128xf32, #tpu.memory_space<vmem>>, vector<32x128xf32>
    %cst_10 = arith.constant dense<0.000000e+00> : vector<8x128xf32>
    %21 = tpu.matmul %17, %20, %cst_10 {dimension_numbers = #tpu.dot_dimension_numbers<[1], [0], [0], [1], [0, 0, 1, 1], [], []>} : vector<8x32xf32>, vector<32x128xf32>, vector<8x128xf32> -> vector<8x128xf32>
    %22 = tpu.transpose %19, [1, 0] : vector<8x32xf32> -> vector<32x8xf32>
    %23 = vector.extract_strided_slice %21 {offsets = [0, 0], sizes = [8, 32], strides = [1, 1]} : vector<8x128xf32> to vector<8x32xf32>
    %cst_11 = arith.constant dense<0.000000e+00> : vector<8x8xf32>
    %24 = tpu.matmul %23, %22, %cst_11 {dimension_numbers = #tpu.dot_dimension_numbers<[1], [0], [0], [1], [0, 0, 1, 1], [], []>} : vector<8x32xf32>, vector<32x8xf32>, vector<8x8xf32> -> vector<8x8xf32>
    %c0_12 = arith.constant 0 : index
    %c0_13 = arith.constant 0 : index
    %c0_14 = arith.constant 0 : index
    %c0_15 = arith.constant 0 : index
    %25 = vector.load %arg5[%c0_12, %c0_13, %c0_14, %c0_15] : memref<1x4x8x8xf32, #tpu.memory_space<vmem>>, vector<1x1x8x8xf32>
    %26 = vector.shape_cast %25 : vector<1x1x8x8xf32> to vector<8x8xf32>
    %27 = vector.shape_cast %24 : vector<8x8xf32> to vector<1x1x8x8xf32>
    tpu.vector_store %arg5[%c0_12, %c0_13, %c0_14, %c0_15], %27 {strides = array<i32>} : memref<1x4x8x8xf32, #tpu.memory_space<vmem>>, vector<1x1x8x8xf32>,
    %28 = vector.extract_strided_slice %21 {offsets = [0, 32], sizes = [8, 32], strides = [1, 1]} : vector<8x128xf32> to vector<8x32xf32>
    %cst_16 = arith.constant dense<0.000000e+00> : vector<8x8xf32>
    %29 = tpu.matmul %28, %22, %cst_16 {dimension_numbers = #tpu.dot_dimension_numbers<[1], [0], [0], [1], [0, 0, 1, 1], [], []>} : vector<8x32xf32>, vector<32x8xf32>, vector<8x8xf32> -> vector<8x8xf32>
    %c0_17 = arith.constant 0 : index
    %c1 = arith.constant 1 : index
    %c0_18 = arith.constant 0 : index
    %c0_19 = arith.constant 0 : index
    %30 = vector.load %arg5[%c0_17, %c1, %c0_18, %c0_19] : memref<1x4x8x8xf32, #tpu.memory_space<vmem>>, vector<1x1x8x8xf32>
    %31 = vector.shape_cast %30 : vector<1x1x8x8xf32> to vector<8x8xf32>
    %32 = vector.shape_cast %29 : vector<8x8xf32> to vector<1x1x8x8xf32>
    tpu.vector_store %arg5[%c0_17, %c1, %c0_18, %c0_19], %32 {strides = array<i32>} : memref<1x4x8x8xf32, #tpu.memory_space<vmem>>, vector<1x1x8x8xf32>,
    %33 = vector.extract_strided_slice %21 {offsets = [0, 64], sizes = [8, 32], strides = [1, 1]} : vector<8x128xf32> to vector<8x32xf32>
    %cst_20 = arith.constant dense<0.000000e+00> : vector<8x8xf32>
    %34 = tpu.matmul %33, %22, %cst_20 {dimension_numbers = #tpu.dot_dimension_numbers<[1], [0], [0], [1], [0, 0, 1, 1], [], []>} : vector<8x32xf32>, vector<32x8xf32>, vector<8x8xf32> -> vector<8x8xf32>
    %c0_21 = arith.constant 0 : index
    %c2 = arith.constant 2 : index
    %c0_22 = arith.constant 0 : index
    %c0_23 = arith.constant 0 : index
    %35 = vector.load %arg5[%c0_21, %c2, %c0_22, %c0_23] : memref<1x4x8x8xf32, #tpu.memory_space<vmem>>, vector<1x1x8x8xf32>
    %36 = vector.shape_cast %35 : vector<1x1x8x8xf32> to vector<8x8xf32>
    %37 = vector.shape_cast %34 : vector<8x8xf32> to vector<1x1x8x8xf32>
    tpu.vector_store %arg5[%c0_21, %c2, %c0_22, %c0_23], %37 {strides = array<i32>} : memref<1x4x8x8xf32, #tpu.memory_space<vmem>>, vector<1x1x8x8xf32>,
    %38 = vector.extract_strided_slice %21 {offsets = [0, 96], sizes = [8, 32], strides = [1, 1]} : vector<8x128xf32> to vector<8x32xf32>
    %cst_24 = arith.constant dense<0.000000e+00> : vector<8x8xf32>
    %39 = tpu.matmul %38, %22, %cst_24 {dimension_numbers = #tpu.dot_dimension_numbers<[1], [0], [0], [1], [0, 0, 1, 1], [], []>} : vector<8x32xf32>, vector<32x8xf32>, vector<8x8xf32> -> vector<8x8xf32>
    %c0_25 = arith.constant 0 : index
    %c3 = arith.constant 3 : index
    %c0_26 = arith.constant 0 : index
    %c0_27 = arith.constant 0 : index
    %40 = vector.load %arg5[%c0_25, %c3, %c0_26, %c0_27] : memref<1x4x8x8xf32, #tpu.memory_space<vmem>>, vector<1x1x8x8xf32>
    %41 = vector.shape_cast %40 : vector<1x1x8x8xf32> to vector<8x8xf32>
    %42 = vector.shape_cast %39 : vector<8x8xf32> to vector<1x1x8x8xf32>
    tpu.vector_store %arg5[%c0_25, %c3, %c0_26, %c0_27], %42 {strides = array<i32>} : memref<1x4x8x8xf32, #tpu.memory_space<vmem>>, vector<1x1x8x8xf32>,
    return
  }
  func.func @transform_0(%arg0: i32, %arg1: i32) -> (i32, i32, i32) {
    %c0_i32 = arith.constant 0 : i32
    %c0_i32_0 = arith.constant 0 : i32
    return %arg0, %arg1, %c0_i32 : i32, i32, i32
  }
  func.func @transform_1(%arg0: i32, %arg1: i32) -> (i32, i32) {
    %c0_i32 = arith.constant 0 : i32
    %c0_i32_0 = arith.constant 0 : i32
    %c0_i32_1 = arith.constant 0 : i32
    return %c0_i32, %c0_i32_0 : i32, i32
  }
  func.func @transform_2(%arg0: i32, %arg1: i32) -> (i32, i32, i32) {
    %c0_i32 = arith.constant 0 : i32
    %c0_i32_0 = arith.constant 0 : i32
    %c0_i32_1 = arith.constant 0 : i32
    return %arg0, %c0_i32, %c0_i32_0 : i32, i32, i32
  }
  func.func @transform_3(%arg0: i32, %arg1: i32) -> (i32, i32, i32, i32) {
    %c0_i32 = arith.constant 0 : i32
    %c0_i32_0 = arith.constant 0 : i32
    %c0_i32_1 = arith.constant 0 : i32
    return %arg0, %c0_i32, %arg1, %c0_i32_0 : i32, i32, i32, i32
  }
}

module attributes {stable_mosaic.version = 11 : i64} {
  func.func @_matching_tensor_kernel(%arg0: i32, %arg1: i32, %arg2: memref<1x8x32xf32, #tpu.memory_space<vmem>>, %arg3: memref<32x128xf32, #tpu.memory_space<vmem>>, %arg4: memref<1x8x32xf32, #tpu.memory_space<vmem>>, %arg5: memref<1x4x8x8xf32, #tpu.memory_space<vmem>>) attributes {dimension_semantics = [#tpu.dimension_semantics<parallel>, #tpu.dimension_semantics<parallel>], iteration_bounds = array<i64: 2, 1>, scalar_prefetch = 0 : i64, scratch_operands = 0 : i64, tpu.core_type = #tpu.core_type<tc>, window_params = [{transform_indices = @transform_0, window_bounds = array<i64: 1, 8, 32>}, {pipeline_mode = #tpu.pipeline_mode<synchronous>, transform_indices = @transform_1, window_bounds = array<i64: 32, 128>}, {transform_indices = @transform_2, window_bounds = array<i64: 1, 8, 32>}, {transform_indices = @transform_3, window_bounds = array<i64: 1, 4, 8, 8>}]} {
    %c0 = arith.constant 0 : index
    %c0_0 = arith.constant 0 : index
    %c0_1 = arith.constant 0 : index
    %0 = vector.load %arg2[%c0, %c0_0, %c0_1] : memref<1x8x32xf32, #tpu.memory_space<vmem>>, vector<1x8x32xf32>
    %1 = vector.shape_cast %0 : vector<1x8x32xf32> to vector<8x32xf32>
    %c0_2 = arith.constant 0 : index
    %c0_3 = arith.constant 0 : index
    %c0_4 = arith.constant 0 : index
    %2 = vector.load %arg4[%c0_2, %c0_3, %c0_4] : memref<1x8x32xf32, #tpu.memory_space<vmem>>, vector<1x8x32xf32>
    %3 = vector.shape_cast %2 : vector<1x8x32xf32> to vector<8x32xf32>
    %4 = arith.mulf %1, %1 : vector<8x32xf32>
    %cst = arith.constant dense<0.000000e+00> : vector<8xf32>
    %5 = vector.multi_reduction <add>, %4, %cst [1] : vector<8x32xf32> to vector<8xf32>
    %6 = vector.shape_cast %5 : vector<8xf32> to vector<8x1xf32>
    %7 = math.rsqrt %6 : vector<8x1xf32>
    %cst_5 = arith.constant 9.99999995E+11 : f32
    %8 = vector.broadcast %cst_5 : f32 to vector<8x1xf32>
    %9 = arith.minimumf %7, %8 : vector<8x1xf32>
    %10 = arith.mulf %3, %3 : vector<8x32xf32>
    %cst_6 = arith.constant dense<0.000000e+00> : vector<8xf32>
    %11 = vector.multi_reduction <add>, %10, %cst_6 [1] : vector<8x32xf32> to vector<8xf32>
    %12 = vector.shape_cast %11 : vector<8xf32> to vector<8x1xf32>
    %13 = math.rsqrt %12 : vector<8x1xf32>
    %cst_7 = arith.constant 9.99999995E+11 : f32
    %14 = vector.broadcast %cst_7 : f32 to vector<8x1xf32>
    %15 = arith.minimumf %13, %14 : vector<8x1xf32>
    %16 = vector.broadcast %9 : vector<8x1xf32> to vector<8x32xf32>
    %17 = arith.mulf %1, %16 : vector<8x32xf32>
    %18 = vector.broadcast %15 : vector<8x1xf32> to vector<8x32xf32>
    %19 = arith.mulf %3, %18 : vector<8x32xf32>
    %c0_8 = arith.constant 0 : index
    %c0_9 = arith.constant 0 : index
    %20 = vector.load %arg3[%c0_8, %c0_9] : memref<32x128xf32, #tpu.memory_space<vmem>>, vector<32x128xf32>
    %cst_10 = arith.constant dense<0.000000e+00> : vector<8x128xf32>
    %21 = tpu.matmul %17, %20, %cst_10 {dimension_numbers = #tpu.dot_dimension_numbers<[1], [0], [0], [1], [0, 0, 1, 1], [], []>} : vector<8x32xf32>, vector<32x128xf32>, vector<8x128xf32> -> vector<8x128xf32>
    %22 = tpu.transpose %19, [1, 0] : vector<8x32xf32> -> vector<32x8xf32>
    %23 = vector.extract_strided_slice %21 {offsets = [0, 0], sizes = [8, 32], strides = [1, 1]} : vector<8x128xf32> to vector<8x32xf32>
    %cst_11 = arith.constant dense<0.000000e+00> : vector<8x8xf32>
    %24 = tpu.matmul %23, %22, %cst_11 {dimension_numbers = #tpu.dot_dimension_numbers<[1], [0], [0], [1], [0, 0, 1, 1], [], []>} : vector<8x32xf32>, vector<32x8xf32>, vector<8x8xf32> -> vector<8x8xf32>
    %c0_12 = arith.constant 0 : index
    %c0_13 = arith.constant 0 : index
    %c0_14 = arith.constant 0 : index
    %c0_15 = arith.constant 0 : index
    %25 = vector.load %arg5[%c0_12, %c0_13, %c0_14, %c0_15] : memref<1x4x8x8xf32, #tpu.memory_space<vmem>>, vector<1x1x8x8xf32>
    %26 = vector.shape_cast %25 : vector<1x1x8x8xf32> to vector<8x8xf32>
    %27 = vector.shape_cast %24 : vector<8x8xf32> to vector<1x1x8x8xf32>
    tpu.vector_store %arg5[%c0_12, %c0_13, %c0_14, %c0_15], %27 {strides = array<i32>} : memref<1x4x8x8xf32, #tpu.memory_space<vmem>>, vector<1x1x8x8xf32>,
    %28 = vector.extract_strided_slice %21 {offsets = [0, 32], sizes = [8, 32], strides = [1, 1]} : vector<8x128xf32> to vector<8x32xf32>
    %cst_16 = arith.constant dense<0.000000e+00> : vector<8x8xf32>
    %29 = tpu.matmul %28, %22, %cst_16 {dimension_numbers = #tpu.dot_dimension_numbers<[1], [0], [0], [1], [0, 0, 1, 1], [], []>} : vector<8x32xf32>, vector<32x8xf32>, vector<8x8xf32> -> vector<8x8xf32>
    %c0_17 = arith.constant 0 : index
    %c1 = arith.constant 1 : index
    %c0_18 = arith.constant 0 : index
    %c0_19 = arith.constant 0 : index
    %30 = vector.load %arg5[%c0_17, %c1, %c0_18, %c0_19] : memref<1x4x8x8xf32, #tpu.memory_space<vmem>>, vector<1x1x8x8xf32>
    %31 = vector.shape_cast %30 : vector<1x1x8x8xf32> to vector<8x8xf32>
    %32 = vector.shape_cast %29 : vector<8x8xf32> to vector<1x1x8x8xf32>
    tpu.vector_store %arg5[%c0_17, %c1, %c0_18, %c0_19], %32 {strides = array<i32>} : memref<1x4x8x8xf32, #tpu.memory_space<vmem>>, vector<1x1x8x8xf32>,
    %33 = vector.extract_strided_slice %21 {offsets = [0, 64], sizes = [8, 32], strides = [1, 1]} : vector<8x128xf32> to vector<8x32xf32>
    %cst_20 = arith.constant dense<0.000000e+00> : vector<8x8xf32>
    %34 = tpu.matmul %33, %22, %cst_20 {dimension_numbers = #tpu.dot_dimension_numbers<[1], [0], [0], [1], [0, 0, 1, 1], [], []>} : vector<8x32xf32>, vector<32x8xf32>, vector<8x8xf32> -> vector<8x8xf32>
    %c0_21 = arith.constant 0 : index
    %c2 = arith.constant 2 : index
    %c0_22 = arith.constant 0 : index
    %c0_23 = arith.constant 0 : index
    %35 = vector.load %arg5[%c0_21, %c2, %c0_22, %c0_23] : memref<1x4x8x8xf32, #tpu.memory_space<vmem>>, vector<1x1x8x8xf32>
    %36 = vector.shape_cast %35 : vector<1x1x8x8xf32> to vector<8x8xf32>
    %37 = vector.shape_cast %34 : vector<8x8xf32> to vector<1x1x8x8xf32>
    tpu.vector_store %arg5[%c0_21, %c2, %c0_22, %c0_23], %37 {strides = array<i32>} : memref<1x4x8x8xf32, #tpu.memory_space<vmem>>, vector<1x1x8x8xf32>,
    %38 = vector.extract_strided_slice %21 {offsets = [0, 96], sizes = [8, 32], strides = [1, 1]} : vector<8x128xf32> to vector<8x32xf32>
    %cst_24 = arith.constant dense<0.000000e+00> : vector<8x8xf32>
    %39 = tpu.matmul %38, %22, %cst_24 {dimension_numbers = #tpu.dot_dimension_numbers<[1], [0], [0], [1], [0, 0, 1, 1], [], []>} : vector<8x32xf32>, vector<32x8xf32>, vector<8x8xf32> -> vector<8x8xf32>
    %c0_25 = arith.constant 0 : index
    %c3 = arith.constant 3 : index
    %c0_26 = arith.constant 0 : index
    %c0_27 = arith.constant 0 : index
    %40 = vector.load %arg5[%c0_25, %c3, %c0_26, %c0_27] : memref<1x4x8x8xf32, #tpu.memory_space<vmem>>, vector<1x1x8x8xf32>
    %41 = vector.shape_cast %40 : vector<1x1x8x8xf32> to vector<8x8xf32>
    %42 = vector.shape_cast %39 : vector<8x8xf32> to vector<1x1x8x8xf32>
    tpu.vector_store %arg5[%c0_25, %c3, %c0_26, %c0_27], %42 {strides = array<i32>} : memref<1x4x8x8xf32, #tpu.memory_space<vmem>>, vector<1x1x8x8xf32>,
    return
  }
  func.func @transform_0(%arg0: i32, %arg1: i32) -> (i32, i32, i32) {
    %c0_i32 = arith.constant 0 : i32
    %c0_i32_0 = arith.constant 0 : i32
    return %arg0, %arg1, %c0_i32 : i32, i32, i32
  }
  func.func @transform_1(%arg0: i32, %arg1: i32) -> (i32, i32) {
    %c0_i32 = arith.constant 0 : i32
    %c0_i32_0 = arith.constant 0 : i32
    %c0_i32_1 = arith.constant 0 : i32
    return %c0_i32, %c0_i32_0 : i32, i32
  }
  func.func @transform_2(%arg0: i32, %arg1: i32) -> (i32, i32, i32) {
    %c0_i32 = arith.constant 0 : i32
    %c0_i32_0 = arith.constant 0 : i32
    %c0_i32_1 = arith.constant 0 : i32
    return %arg0, %c0_i32, %c0_i32_0 : i32, i32, i32
  }
  func.func @transform_3(%arg0: i32, %arg1: i32) -> (i32, i32, i32, i32) {
    %c0_i32 = arith.constant 0 : i32
    %c0_i32_0 = arith.constant 0 : i32
    %c0_i32_1 = arith.constant 0 : i32
    return %arg0, %c0_i32, %arg1, %c0_i32_0 : i32, i32, i32, i32
  }
}

</mosaic_0001>

<bundles_post_ra>
// kernel: tpu_custom_call.1
= control target key start
LH: loop header
LB: loop body
LE: loop exit
PB: predicated region body
PF: predicated region fallthrough
CT: control target
= control target key end

     0   :  { %s1444_s0 = inlined_call_operand.hbm [shape: f32[2,8,32], index: 0, kind: input, shape index: {}]   ;;  %s1445_s1 = inlined_call_operand.hbm [shape: f32[32,128], index: 1, kind: input, shape index: {}]   ;;  %s1446_s2 = inlined_call_operand.hbm [shape: f32[2,8,32], index: 2, kind: input, shape index: {}]   ;;  %s1447_s3 = inlined_call_operand.hbm [shape: f32[2,4,8,8], index: 3, kind: output, shape index: {}]  }
   0x1   :  { %1453 = sst [smem:[#allocation13_spill]] %s1444_s0 }
   0x2   :  { %8 = vsyncpa [#allocation3], 0 }
   0x3   :  { %10 = vsyncpa [#allocation3 + $0x1], 0 }
   0x4   :  { %11 = vsyncpa [#allocation6], 0 }
   0x5   :  { %12 = vsyncpa [#allocation4], 0 }
   0x6   :  { %14 = vsyncpa [#allocation4 + $0x1], 0  ;;  %s1169_s12 = smov 0   ;;  %s1171_s13 = smov 0  }
   0x7   :  { %s1173_s14 = smov 0   ;;  %s1175_s15 = smov 0  }
   0x8   :  { %s1177_s16 = smov 0   ;;  %s1179_s17 = smov 0  }
   0x9 LB: > { %s32_s18 = sadd.s32 1, %s1129_s16  ;;  %s41_s19 = sadd.s32 1, %s1121_s14  ;;  %s1133_s17 = sphi %s1179_s17, %s20_s17   ;;  %s1129_s16 = sphi %s1177_s16, %s1473_s16   ;;  %s1125_s15 = sphi %s1175_s15, %s1472_s15   ;;  %s1121_s14 = sphi %s1173_s14, %s1471_s14   ;;  %s1117_s13 = sphi %s1171_s13, %s1470_s13   ;;  %s1113_s12 = sphi %s1169_s12, %s1469_s12  }
   0xa   : > { %p34_p0 = scmp.ge.s32.totalorder %s32_s18, 2  ;;  %p48_p1 = scmp.ne.s32.totalorder %s1121_s14, %s1117_s13 }
   0xb   : > { %p49_p2 = scmp.eq.s32.totalorder %s1133_s17, 0  ;;  %p889_p5 = scmp.lt.s32.totalorder %s1133_s17, 2 }
   0xc   : > { %s1475_s18 = smov (%p34_p0, %s32_s18), 0  ;;  %s166_s21 = sand.u32 1, %s1133_s17  }
   0xd   : > { %p50_p4 = por %p49_p2, %p48_p1  ;;  %s36_s20 = ssub.s32 %s1129_s16, %s1475_s18 }
   0xe   : > { %p39_p6 = scmp.eq.s32.totalorder %s36_s20, 0  ;;  %s168_s22 = sand.u32 1, %s1121_s14  }
   0xf   : > { %s787_s23 = sshll.u32 %s1129_s16, 7  ;;  %s1219_s25 = sshll.u32 %s168_s22, 3 }
  0x10   : > { %s1217_s24 = scalar_select %p39_p6, %s1121_s14, %s41_s19  }
  0x11   : > { %s1454_s0 = sld [smem:[#allocation13_spill]]  ;;  %p1228_p7 = pnand %p889_p5, %p50_p4 }
  0x12   : > { %s170_s30 = scalar_lea.vmem [#allocation2], %s1219_s25  ;;  %s1235_s5 = scalar_lea.sflag [#allocation3], %s166_s21 }
  0x13   : > { %s178_s4 = sshll.u32 %s170_s30, 4  ;;  %p957_p9 = pneg %p1228_p7  ;;  %s1233_s4 = int_to_ptr.vmem [resolvable:$true] %s178_s4 }
  0x17   : > { %s1226_s28 = scalar_lea.hbm %s1454_s0, %s787_s23  ;;  %s960_s9 = scalar_lea.hbm %s1454_s0, 256 }
  0x18   : > { %s955_s6 = scalar_lea.hbm %s1226_s28, 128  ;;  %p961_p12 = scmp.lt.u32.totalorder %s1226_s28, %s1454_s0 }
  0x19   : > { %p956_p8 = scmp.ne.s32.totalorder %s1226_s28, %s955_s6  ;;  %p962_p13 = scmp.lt.u32.totalorder %s960_s9, %s955_s6 }
  0x1a   : > { %p964_p2 = scmp.lt.u32.totalorder %s955_s6, %s1226_s28 }
  0x1b   : > { %p958_p10 = pnand %p957_p9, %p956_p8  ;;  %p963_p0 = por %p962_p13, %p961_p12 }
  0x1d   : > { %p959_p11 = pneg %p958_p10  ;;  %p965_p4 = por %p964_p2, %p963_p0 }
  0x1f   : > { %p966_p5 = pnand %p965_p4, %p959_p11 }
  0x21   : > { %969 = shalt.err (!%p966_p5)
}
  0x22   : > { %s970_s19 = scalar_lea.vmem %s1233_s4, 128  ;;  %s1135_s20 = smov [#allocation2]  }
  0x23   : > { %p971_p6 = scmp.ne.s32.totalorder %s1233_s4, %s970_s19  ;;  %s975_s21 = sshll.u32 %s1135_s20, 4  ;;  %s976_s21 = int_to_ptr.vmem [resolvable:$false] %s975_s21 }
  0x24   : > { %s977_s22 = scalar_lea.vmem %s976_s21, 256  ;;  %p978_p3 = scmp.lt.s32.totalorder %s1233_s4, %s976_s21 }
  0x25   : > { %p973_p8 = pnand %p971_p6, %p957_p9  ;;  %p979_p12 = scmp.lt.s32.totalorder %s977_s22, %s970_s19 }
  0x27   : > { %p974_p10 = pneg %p973_p8  ;;  %p980_p13 = por %p979_p12, %p978_p3 }
  0x29   : > { %p981_p0 = pnand %p980_p13, %p974_p10 }
  0x2b   : > { %984 = shalt.err (!%p981_p0)
}
  0x2c   : > { %880 = dma.hbm_to_vmem [thread:$0]  (!%p1228_p7), %s1226_s28, 128, %s1233_s4, %s1235_s5  }
  0x2d   : > { %s1264_s26 = sadd.s32 4294967295, %s1133_s17   ;;  %s782_s27 = sadd.s32 4294967294, %s1133_s17  }
  0x2e   : > { %p54_p3 = scmp.ne.s32.totalorder %s1117_s13, %s1113_s12  ;;  %p1448_p11 = scmp.eq.s32.totalorder %s1264_s26, 0 }
  0x2f   : > { %p127_p2 = scmp.eq.s32.totalorder %s1264_s26, 1  ;;  %p133_p4 = scmp.eq.s32.totalorder %s782_s27, 1 }
  0x30   : > { %p783_p5 = scmp.ge.s32.totalorder %s1133_s17, 1  ;;  %p1274_p6 = por %p1448_p11, %p54_p3 }
  0x31   : > { %p1281_p8 = por %p127_p2, %p48_p1  ;;  %p1285_p10 = por %p133_p4, %p54_p3 }
  0x32   : > { %s1456_s30 = scalar_select %p1274_p6, 1, 0 }
  0x33   : > { %s1457_s28 = scalar_select %p1281_p8, 1, 0 }
  0x34   : > { %s1458_s4 = scalar_select %p1285_p10, 1, 0 }
  0x35   : > { %p140_p12 = scmp.lt.s32.totalorder %s1133_s17, 3  ;;  %s1136_s7 = smov [#allocation5]  }
  0x36   : > { %s152_s8 = sshll.u32 %s1136_s7, 4  ;;  %s1299_s11 = scalar_lea.hbm %s1446_s2, %s787_s23  ;;  %s1301_s8 = int_to_ptr.vmem [resolvable:$true] %s152_s8 }
  0x37   : > { %p1290_p13 = pnand %p783_p5, %p140_p12  ;;  %s189_s19 = scalar_lea.vmem [#allocation7], %s1219_s25 }
  0x38   : > { %s196_s20 = sshll.u32 %s189_s19, 4  ;;  %s985_s22 = scalar_lea.hbm %s1299_s11, 128  ;;  %s197_s20 = int_to_ptr.vmem [resolvable:$true] %s196_s20 }
  0x39   : > { %s1459_s6 = scalar_select %p1290_p13, 1, 0 }
  0x3a   : > { %p873_p1 = pneg %p1290_p13  ;;  %p986_p3 = scmp.ne.s32.totalorder %s1299_s11, %s985_s22 }
  0x3b   : > { %s990_s7 = scalar_lea.hbm %s1446_s2, 256  ;;  %p991_p5 = scmp.lt.u32.totalorder %s1299_s11, %s1446_s2 }
  0x3c   : > { %p1308_p0 = pnand %p873_p1, %p1448_p11  ;;  %p988_p2 = pnand %p986_p3, %p957_p9 }
  0x3d   : > { %p992_p12 = scmp.lt.u32.totalorder %s990_s7, %s985_s22  ;;  %p994_p11 = scmp.lt.u32.totalorder %s985_s22, %s1299_s11 }
  0x3e   : > { %s1460_s21 = scalar_select %p1308_p0, 1, 0 }
  0x3f   : > { %p989_p4 = pneg %p988_p2  ;;  %p993_p1 = por %p992_p12, %p991_p5 }
  0x41   : > { %p995_p10 = por %p994_p11, %p993_p1 }
  0x43   : > { %p996_p8 = pnand %p995_p10, %p989_p4 }
  0x45   : > { %999 = shalt.err (!%p996_p8)
}
  0x46   : > { %s1000_s25 = scalar_lea.vmem %s197_s20, 128  ;;  %s1137_s19 = smov [#allocation7]  }
  0x47   : > { %p1001_p6 = scmp.ne.s32.totalorder %s197_s20, %s1000_s25  ;;  %s1005_s23 = sshll.u32 %s1137_s19, 4  ;;  %s1006_s23 = int_to_ptr.vmem [resolvable:$false] %s1005_s23 }
  0x48   : > { %s1007_s27 = scalar_lea.vmem %s1006_s23, 256  ;;  %p1008_p13 = scmp.lt.s32.totalorder %s197_s20, %s1006_s23 }
  0x49   : > { %p1003_p3 = pnand %p1001_p6, %p957_p9  ;;  %p1009_p0 = scmp.lt.s32.totalorder %s1007_s27, %s1000_s25 }
  0x4b   : > { %p1004_p2 = pneg %p1003_p3  ;;  %p1010_p5 = por %p1009_p0, %p1008_p13 }
  0x4d   : > { %p1011_p12 = pnand %p1010_p5, %p1004_p2 }
  0x4f   : > { %1014 = shalt.err (!%p1011_p12)
}
  0x50   : > { %883 = dma.hbm_to_vmem [thread:$0]  (!%p1228_p7), %s1299_s11, 128, %s197_s20, %s1235_s5  }
  0x51   : > { %s1015_s9 = scalar_lea.hbm %s1445_s1, 512  ;;  %p1461_p11 = scmp.ne.s32.totalorder %s1460_s21, 0 }
  0x52   : > { %p1016_p9 = scmp.ne.s32.totalorder %s1445_s1, %s1015_s9  ;;  %p1022_p13 = scmp.lt.u32.totalorder %s1015_s9, %s1445_s1 }
  0x53   : > { %p1017_p6 = pneg %p1461_p11 }
  0x55   : > { %p1018_p8 = pnand %p1017_p6, %p1016_p9 }
  0x57   : > { %p1019_p10 = pneg %p1018_p8 }
  0x59   : > { %p1024_p0 = pnand %p1022_p13, %p1019_p10 }
  0x5b   : > { %1027 = shalt.err (!%p1024_p0)
}
  0x5c   : > { %s1028_s29 = scalar_lea.vmem %s1301_s8, 512  ;;  %p1036_p3 = scmp.lt.s32.totalorder %s1301_s8, %s1301_s8 }
  0x5d   : > { %p1029_p7 = scmp.ne.s32.totalorder %s1301_s8, %s1028_s29  ;;  %p1037_p2 = scmp.lt.s32.totalorder %s1028_s29, %s1028_s29 }
  0x5f   : > { %p1031_p4 = pnand %p1029_p7, %p1017_p6  ;;  %p1038_p5 = por %p1037_p2, %p1036_p3 }
  0x61   : > { %p1032_p1 = pneg %p1031_p4 }
  0x63   : > { %p1039_p12 = pnand %p1038_p5, %p1032_p1 }
  0x65   : > { %1042 = shalt.err (!%p1039_p12)
}
  0x66   : > { %s1138_s0 = smov 128   ;;  %s1139_s5 = smov 8  }
  0x67   : > { %876 = dma.hbm_to_vmem [thread:$0]  (!%p1461_p11), %s1445_s1, 512, %s1301_s8, [#allocation6], %s1138_s0, %s1138_s0, %s1139_s5  }
  0x68   : > { %p1462_p9 = scmp.ne.s32.totalorder %s1459_s6, 0 }
  0x69   : > { %s207_s23 = sand.u32 (!%p1462_p9), 1, %s1264_s26   ;;  %s1357_s27 = sand.u32 (!%p1462_p9), 1, %s1117_s13  }
  0x6a   : > { %205 = sbr.rel (%p1462_p9) target bundleno = 839 (0x347), region = 32  ;;  %s791_s22 = sshll.u32 (!%p1462_p9), %s1357_s27, 3 }
  0x6b   : > { %s208_s7 = scalar_lea.sflag (!%p1462_p9), [#allocation3], %s207_s23  ;;  %s211_s9 = scalar_lea.vmem (!%p1462_p9), [#allocation2], %s791_s22 }
  0x6c   : > { %p1463_p6 = scmp.ne.s32.totalorder (!%p1462_p9), %s1456_s30, 0 }
  0x71   : > { %1096 = dma.done.wait (%p1463_p6), %s208_s7, 128  }
  0x72   : > { %1098 = vsyncadd (%p1463_p6), %s208_s7, 4294967168  ;;  %p1464_p11 = scmp.eq.s32.totalorder %s1264_s26, 0 }
  0x74   : > { %1100 = dma.done.wait (%p1464_p11), [#allocation6], 512   ;;  %p1465_p8 = pmov %p1464_p11 }
  0x75   : > { %s224_s6 = scalar_lea.vmem [#allocation7], %s791_s22 }
  0x76   : > { %1102 = vsyncadd (%p1465_p8), [#allocation6], 4294966784 }
  0x77   : > { %1104 = dma.done.wait (%p1463_p6), %s208_s7, 128  }
  0x78   : > { %1106 = vsyncadd (%p1463_p6), %s208_s7, 4294967168  ;;  %v252_v0 = vld [vmem:[%s211_s9] sm:$0xff]  ;;  %vm255_vm0 = vcmask 261120   ;;  %v269_v3 = vld [vmem:[#allocation5] sm:$0xff]  ;;  %v1140_v6 = vmov 0.0|0.0   ;;  %vm1141_vm1 = vmmov 0  }
  0x79   : > { %v254_v1 = vmul.f32 %v252_v0, %v252_v0  ;;  %v270_v4 = vld [vmem:[#allocation5 + $0x8] sm:$0xff]  ;;  %857 = vmatprep.subr.bf16.mxu0 %v1140_v6  ;;  %v271_v7 = vld [vmem:[#allocation5 + $0x10] sm:$0xff]  ;;  %v272_v8 = vld [vmem:[#allocation5 + $0x18] sm:$0xff]  ;;  %v1142_v10 = vmov 0.0   ;;  %s1143_s26 = smov 32   ;;  %s1144_s30 = smov 96  }
  0x7a   : > { %v858_v5 = vpack.c.bf16 %v270_v4, %v269_v3  ;;  %v861_v9 = vpack.c.bf16 %v272_v8, %v271_v7  ;;  %834 = vmatprep.mubr.msk.f32.mxu0 %vm1141_vm1, %v1142_v10  ;;  %837 = vmatprep.subr.mxu1 %v1142_v10  ;;  %v253_v11 = vld [vmem:[%s224_s6] sm:$0xff]  ;;  %s1145_s8 = smov 64   ;;  %s794_s21 = sshll.u32 %s1357_s27, 5  ;;  %vm422_vm2 = vcmask 64512  }
  0x7b   : > { %v256_v2 = vsel %vm255_vm0, %v254_v1, 0.0  ;;  %839 = vmatprep.mubr.msk.f32.mxu1 %vm1141_vm1, %v1142_v10  ;;  %v261_v12 = vmul.f32 %v253_v11, %v253_v11  ;;  %s251_s10 = scalar_lea.vmem [#allocation8], %s794_s21  ;;  %s812_s19 = sshll.u32 %s1125_s15, 9 }
  0x7c   : > { %257 = vadd.xlane.f32.xlu0 %v256_v2  ;;  %859 = vmatpush3.bf16.msra.mxu0 %v858_v5  ;;  %s667_s25 = sshll.u32 %s251_s10, 4  ;;  %s1395_s5 = scalar_lea.hbm %s1447_s3, %s812_s19  ;;  %s1390_s25 = int_to_ptr.vmem [resolvable:$true] %s667_s25 }
  0x7d   : > { %860 = vmatprep.subr.bf16.mxu0 %v1140_v6  ;;  %v262_v13 = vsel %vm255_vm0, %v261_v12, 0.0  ;;  %s653_s15 = scalar_lea.sflag [#allocation4], %s1357_s27  ;;  %s1043_s11 = scalar_lea.vmem %s1390_s25, 512 }
  0x7e   : > { %p1044_p10 = scmp.ne.s32.totalorder %s1390_s25, %s1043_s11  ;;  %p1466_p13 = scmp.ne.s32.totalorder %s1457_s28, 0 }
  0x7f   : > { %s1146_s20 = smov [#allocation8]  }
  0x80   : > { %862 = vmatpush3.bf16.msra.mxu0 %v861_v9  ;;  %263 = vadd.xlane.f32.xlu0 %v262_v13  ;;  %p1045_p0 = pnand %p1044_p10, %p1466_p13  ;;  %s1047_s23 = sshll.u32 %s1146_s20, 4  ;;  %s1048_s23 = int_to_ptr.vmem [resolvable:$false] %s1047_s23 }
  0x81   : > { %847 = vmatprep.subr.mxu0 %v1142_v10  ;;  %s1049_s22 = scalar_lea.vmem %s1048_s23, 1024  ;;  %p1050_p4 = scmp.lt.s32.totalorder %s1390_s25, %s1048_s23 }
  0x82   : > { %p1046_p7 = pneg %p1045_p0  ;;  %p1051_p1 = scmp.lt.s32.totalorder %s1049_s22, %s1043_s11 }
  0x84   : > { %p1052_p3 = por %p1051_p1, %p1050_p4 }
  0x86   : > { %p1053_p2 = pnand %p1052_p3, %p1046_p7 }
 0x109   : > { %v258_v14 = vpop.xlane.xlu0 %257 }
 0x10a   : > { %951 = vrsqrt.f32 %v258_v14 }
 0x10d   : > { %v264_v18 = vpop.xlane.xlu0 %263 }
 0x10e   : > { %953 = vrsqrt.f32 %v264_v18 }
 0x114   : > { %v952_v15 = vpop.eup %951 }
 0x115   : > { %v260_v16 = vmin.f32 %v952_v15, 1e+12 }
 0x117   : > { %v267_v17 = vmul.f32 %v260_v16, %v252_v0 }
 0x118   : > { %v954_v19 = vpop.eup %953 }
 0x119   : > { %835 = vmatmul.mubr.msk.f32.vlgmr.msra.gmra.mrb[0].mxu0 %vm255_vm0, %v267_v17  ;;  %v266_v20 = vmin.f32 %v954_v19, 1e+12 }
 0x11a   : > { %849 = vmatprep.mubr.msk.f32.mxu0 %vm1141_vm1, %v1142_v10 }
 0x11b   : > { %v268_v21 = vmul.f32 %v266_v20, %v253_v11 }
 0x11d   : > { %838 = vmatpush3.xpose.msk.msra.mxu1 %vm255_vm0, %v268_v21  ;;  %848 = vmatpush3.xpose.msk.msra.mxu0 %vm255_vm0, %v268_v21 }
 0x11e   : > { %842 = vmatprep.subr.mxu1 %v1142_v10 }
 0x1ec   : > { %v342_v22 = vpop.f32.mrb[0].mxu0 }
 0x1ed   : > { %576 = vrot.lane.b32.xlu0 %v342_v22, %s1143_s26  ;;  %424 = vrot.lane.b32.xlu1 %v342_v22, %s1144_s30  ;;  %v836_v23 = vpop.f32.mrb[1].mxu0 }
 0x1ee   : > { %840 = vmatmul.mubr.msk.f32.vlgmr.msra.gmra.mrb[0].mxu1 %vm255_vm0, %v342_v22 }
 0x1ef   : > { %843 = vmatpush3.xpose.msk.msra.mxu1 %vm255_vm0, %v268_v21  ;;  %844 = vmatprep.mubr.msk.f32.mxu1 %vm1141_vm1, %v1142_v10 }
 0x1f0   : > { %852 = vmatprep.subr.mxu1 %v1142_v10 }
 0x1f1   : > { %500 = vrot.lane.b32.xlu1 %v342_v22, %s1145_s8 }
 0x25f   : > { %v425_v24 = vpop.permute.xlu1 %424  ;;  %v577_v25 = vpop.permute.xlu0 %576 }
 0x260   : > { %845 = vmatmul.mubr.msk.f32.vlgmr.msra.gmra.mrb[2].mxu1 %vm255_vm0, %v425_v24 }
 0x261   : > { %853 = vmatpush3.xpose.msk.msra.mxu1 %vm255_vm0, %v268_v21  ;;  %854 = vmatprep.mubr.msk.f32.mxu1 %vm1141_vm1, %v1142_v10 }
 0x263   : > { %v501_v26 = vpop.permute.xlu1 %500 }
 0x264   : > { %850 = vmatmul.mubr.msk.f32.vlgmr.msra.gmra.mrb[2].mxu0 %vm255_vm0, %v501_v26  ;;  %855 = vmatmul.mubr.msk.f32.vlgmr.msra.gmra.mrb[4].mxu1 %vm255_vm0, %v577_v25 }
 0x2c1   : > { %v418_v27 = vpop.f32.mrb[0].mxu1 }
 0x2c2   : > { %423 = vst.msk [vmem:[%s251_s10] sm:$0xff] %vm422_vm2, %v418_v27  ;;  %v841_v28 = vpop.f32.mrb[1].mxu1 }
 0x333   : > { %v494_v29 = vpop.f32.mrb[2].mxu1 }
 0x334   : > { %800 = vst.msk [vmem:[%s251_s10 + $0x8] sm:$0xff] %vm422_vm2, %v494_v29  ;;  %v846_v30 = vpop.f32.mrb[3].mxu1 }
 0x337   : > { %v570_v31 = vpop.f32.mrb[2].mxu0  ;;  %v646_v32 = vpop.f32.mrb[4].mxu1 }
 0x338   : > { %803 = vst.msk [vmem:[%s251_s10 + $0x10] sm:$0xff] %vm422_vm2, %v570_v31  ;;  %806 = vst.msk [vmem:[%s251_s10 + $0x18] sm:$0xff] %vm422_vm2, %v646_v32  ;;  %v851_v33 = vpop.f32.mrb[3].mxu0  ;;  %v856_v34 = vpop.f32.mrb[5].mxu1 }
 0x339   : > { %1056 = shalt.err (!%p1053_p2)
}
 0x33a   : > { %s1057_s7 = scalar_lea.hbm %s1395_s5, 512  ;;  %s1061_s26 = scalar_lea.hbm %s1447_s3, 1024 }
 0x33b   : > { %p1058_p5 = scmp.ne.s32.totalorder %s1395_s5, %s1057_s7  ;;  %p1062_p6 = scmp.lt.u32.totalorder %s1395_s5, %s1447_s3 }
 0x33c   : > { %p1063_p11 = scmp.lt.u32.totalorder %s1061_s26, %s1057_s7  ;;  %p1065_p10 = scmp.lt.u32.totalorder %s1057_s7, %s1395_s5 }
 0x33d   : > { %p1059_p12 = pnand %p1058_p5, %p1466_p13 }
 0x33e   : > { %p1064_p8 = por %p1063_p11, %p1062_p6 }
 0x33f   : > { %p1060_p9 = pneg %p1059_p12 }
 0x340   : > { %p1066_p0 = por %p1065_p10, %p1064_p8 }
 0x342   : > { %p1067_p7 = pnand %p1066_p0, %p1060_p9 }
 0x344   : > { %1070 = shalt.err (!%p1067_p7)
}
 0x345   : > { %s1147_s21 = smov 128   ;;  %s1148_s10 = smov 8  }
 0x346   : > { %871 = dma.vmem_to_hbm [thread:$0]  (%p1466_p13), %s1390_s25, 512, %s1395_s5, %s653_s15, %s1147_s21, %s1147_s21, %s1148_s10  }
 0x347 PF: > { %s682_s19 = sand.u32 1, %s1113_s12   ;;  %p1467_p4 = scmp.ne.s32.totalorder %s1458_s4, 0 }
 0x348   : > { %p1468_p1 = scmp.ge.s32.totalorder %s1133_s17, 2  ;;  %s683_s29 = scalar_lea.sflag [#allocation4], %s682_s19 }
 0x34a   : > { %p885_p3 = pnand %p1468_p1, %p1467_p4 }
 0x34c   : > { %1108 = dma.done.wait (!%p885_p3), %s683_s29, 512  }
 0x34d   : > { %1110 = vsyncadd (!%p885_p3), %s683_s29, 4294966784  ;;  %s20_s17 = sadd.s32 1, %s1133_s17   ;;  %s1469_s12 = smov %s1117_s13 }
 0x34e   : > { %p17_p2 = scmp.ge.s32.totalorder %s20_s17, 4   ;;  %s1470_s13 = smov %s1121_s14 }
 0x34f   : > { %s1471_s14 = smov %s1217_s24  ;;  %s1472_s15 = smov %s1129_s16 }
 0x350   : > { %s1473_s16 = smov %s1475_s18  ;;  %19 = sbr.rel (!%p17_p2) target bundleno = 9 (0x9), region = 95 }
 0x357   :  { %688 = vsyncpa [#allocation3], 1 }
 0x358   :  { %690 = vsyncpa [#allocation3 + $0x1], 1 }
 0x359   :  { %691 = vsyncpa [#allocation6], 1 }
 0x35a   :  { %692 = vsyncpa [#allocation4], 1 }
 0x35b   :  { %694 = vsyncpa [#allocation4 + $0x1], 1 }

// kernel: tpu_custom_call.1
= control target key start
LH: loop header
LB: loop body
LE: loop exit
PB: predicated region body
PF: predicated region fallthrough
CT: control target
= control target key end

     0   :  { %s1444_s0 = inlined_call_operand.hbm [shape: f32[2,8,32], index: 0, kind: input, shape index: {}]   ;;  %s1445_s1 = inlined_call_operand.hbm [shape: f32[32,128], index: 1, kind: input, shape index: {}]   ;;  %s1446_s2 = inlined_call_operand.hbm [shape: f32[2,8,32], index: 2, kind: input, shape index: {}]   ;;  %s1447_s3 = inlined_call_operand.hbm [shape: f32[2,4,8,8], index: 3, kind: output, shape index: {}]  }
   0x1   :  { %1453 = sst [smem:[#allocation13_spill]] %s1444_s0 }
   0x2   :  { %8 = vsyncpa [#allocation3], 0 }
   0x3   :  { %10 = vsyncpa [#allocation3 + $0x1], 0 }
   0x4   :  { %11 = vsyncpa [#allocation6], 0 }
   0x5   :  { %12 = vsyncpa [#allocation4], 0 }
   0x6   :  { %14 = vsyncpa [#allocation4 + $0x1], 0  ;;  %s1169_s12 = smov 0   ;;  %s1171_s13 = smov 0  }
   0x7   :  { %s1173_s14 = smov 0   ;;  %s1175_s15 = smov 0  }
   0x8   :  { %s1177_s16 = smov 0   ;;  %s1179_s17 = smov 0  }
   0x9 LB: > { %s32_s18 = sadd.s32 1, %s1129_s16  ;;  %s41_s19 = sadd.s32 1, %s1121_s14  ;;  %s1133_s17 = sphi %s1179_s17, %s20_s17   ;;  %s1129_s16 = sphi %s1177_s16, %s1473_s16   ;;  %s1125_s15 = sphi %s1175_s15, %s1472_s15   ;;  %s1121_s14 = sphi %s1173_s14, %s1471_s14   ;;  %s1117_s13 = sphi %s1171_s13, %s1470_s13   ;;  %s1113_s12 = sphi %s1169_s12, %s1469_s12  }
   0xa   : > { %p34_p0 = scmp.ge.s32.totalorder %s32_s18, 2  ;;  %p48_p1 = scmp.ne.s32.totalorder %s1121_s14, %s1117_s13 }
   0xb   : > { %p49_p2 = scmp.eq.s32.totalorder %s1133_s17, 0  ;;  %p889_p5 = scmp.lt.s32.totalorder %s1133_s17, 2 }
   0xc   : > { %s1475_s18 = smov (%p34_p0, %s32_s18), 0  ;;  %s166_s21 = sand.u32 1, %s1133_s17  }
   0xd   : > { %p50_p4 = por %p49_p2, %p48_p1  ;;  %s36_s20 = ssub.s32 %s1129_s16, %s1475_s18 }
   0xe   : > { %p39_p6 = scmp.eq.s32.totalorder %s36_s20, 0  ;;  %s168_s22 = sand.u32 1, %s1121_s14  }
   0xf   : > { %s787_s23 = sshll.u32 %s1129_s16, 7  ;;  %s1219_s25 = sshll.u32 %s168_s22, 3 }
  0x10   : > { %s1217_s24 = scalar_select %p39_p6, %s1121_s14, %s41_s19  }
  0x11   : > { %s1454_s0 = sld [smem:[#allocation13_spill]]  ;;  %p1228_p7 = pnand %p889_p5, %p50_p4 }
  0x12   : > { %s170_s30 = scalar_lea.vmem [#allocation2], %s1219_s25  ;;  %s1235_s5 = scalar_lea.sflag [#allocation3], %s166_s21 }
  0x13   : > { %s178_s4 = sshll.u32 %s170_s30, 4  ;;  %p957_p9 = pneg %p1228_p7  ;;  %s1233_s4 = int_to_ptr.vmem [resolvable:$true] %s178_s4 }
  0x17   : > { %s1226_s28 = scalar_lea.hbm %s1454_s0, %s787_s23  ;;  %s960_s9 = scalar_lea.hbm %s1454_s0, 256 }
  0x18   : > { %s955_s6 = scalar_lea.hbm %s1226_s28, 128  ;;  %p961_p12 = scmp.lt.u32.totalorder %s1226_s28, %s1454_s0 }
  0x19   : > { %p956_p8 = scmp.ne.s32.totalorder %s1226_s28, %s955_s6  ;;  %p962_p13 = scmp.lt.u32.totalorder %s960_s9, %s955_s6 }
  0x1a   : > { %p964_p2 = scmp.lt.u32.totalorder %s955_s6, %s1226_s28 }
  0x1b   : > { %p958_p10 = pnand %p957_p9, %p956_p8  ;;  %p963_p0 = por %p962_p13, %p961_p12 }
  0x1d   : > { %p959_p11 = pneg %p958_p10  ;;  %p965_p4 = por %p964_p2, %p963_p0 }
  0x1f   : > { %p966_p5 = pnand %p965_p4, %p959_p11 }
  0x21   : > { %969 = shalt.err (!%p966_p5)
}
  0x22   : > { %s970_s19 = scalar_lea.vmem %s1233_s4, 128  ;;  %s1135_s20 = smov [#allocation2]  }
  0x23   : > { %p971_p6 = scmp.ne.s32.totalorder %s1233_s4, %s970_s19  ;;  %s975_s21 = sshll.u32 %s1135_s20, 4  ;;  %s976_s21 = int_to_ptr.vmem [resolvable:$false] %s975_s21 }
  0x24   : > { %s977_s22 = scalar_lea.vmem %s976_s21, 256  ;;  %p978_p3 = scmp.lt.s32.totalorder %s1233_s4, %s976_s21 }
  0x25   : > { %p973_p8 = pnand %p971_p6, %p957_p9  ;;  %p979_p12 = scmp.lt.s32.totalorder %s977_s22, %s970_s19 }
  0x27   : > { %p974_p10 = pneg %p973_p8  ;;  %p980_p13 = por %p979_p12, %p978_p3 }
  0x29   : > { %p981_p0 = pnand %p980_p13, %p974_p10 }
  0x2b   : > { %984 = shalt.err (!%p981_p0)
}
  0x2c   : > { %880 = dma.hbm_to_vmem [thread:$0]  (!%p1228_p7), %s1226_s28, 128, %s1233_s4, %s1235_s5  }
  0x2d   : > { %s1264_s26 = sadd.s32 4294967295, %s1133_s17   ;;  %s782_s27 = sadd.s32 4294967294, %s1133_s17  }
  0x2e   : > { %p54_p3 = scmp.ne.s32.totalorder %s1117_s13, %s1113_s12  ;;  %p1448_p11 = scmp.eq.s32.totalorder %s1264_s26, 0 }
  0x2f   : > { %p127_p2 = scmp.eq.s32.totalorder %s1264_s26, 1  ;;  %p133_p4 = scmp.eq.s32.totalorder %s782_s27, 1 }
  0x30   : > { %p783_p5 = scmp.ge.s32.totalorder %s1133_s17, 1  ;;  %p1274_p6 = por %p1448_p11, %p54_p3 }
  0x31   : > { %p1281_p8 = por %p127_p2, %p48_p1  ;;  %p1285_p10 = por %p133_p4, %p54_p3 }
  0x32   : > { %s1456_s30 = scalar_select %p1274_p6, 1, 0 }
  0x33   : > { %s1457_s28 = scalar_select %p1281_p8, 1, 0 }
  0x34   : > { %s1458_s4 = scalar_select %p1285_p10, 1, 0 }
  0x35   : > { %p140_p12 = scmp.lt.s32.totalorder %s1133_s17, 3  ;;  %s1136_s7 = smov [#allocation5]  }
  0x36   : > { %s152_s8 = sshll.u32 %s1136_s7, 4  ;;  %s1299_s11 = scalar_lea.hbm %s1446_s2, %s787_s23  ;;  %s1301_s8 = int_to_ptr.vmem [resolvable:$true] %s152_s8 }
  0x37   : > { %p1290_p13 = pnand %p783_p5, %p140_p12  ;;  %s189_s19 = scalar_lea.vmem [#allocation7], %s1219_s25 }
  0x38   : > { %s196_s20 = sshll.u32 %s189_s19, 4  ;;  %s985_s22 = scalar_lea.hbm %s1299_s11, 128  ;;  %s197_s20 = int_to_ptr.vmem [resolvable:$true] %s196_s20 }
  0x39   : > { %s1459_s6 = scalar_select %p1290_p13, 1, 0 }
  0x3a   : > { %p873_p1 = pneg %p1290_p13  ;;  %p986_p3 = scmp.ne.s32.totalorder %s1299_s11, %s985_s22 }
  0x3b   : > { %s990_s7 = scalar_lea.hbm %s1446_s2, 256  ;;  %p991_p5 = scmp.lt.u32.totalorder %s1299_s11, %s1446_s2 }
  0x3c   : > { %p1308_p0 = pnand %p873_p1, %p1448_p11  ;;  %p988_p2 = pnand %p986_p3, %p957_p9 }
  0x3d   : > { %p992_p12 = scmp.lt.u32.totalorder %s990_s7, %s985_s22  ;;  %p994_p11 = scmp.lt.u32.totalorder %s985_s22, %s1299_s11 }
  0x3e   : > { %s1460_s21 = scalar_select %p1308_p0, 1, 0 }
  0x3f   : > { %p989_p4 = pneg %p988_p2  ;;  %p993_p1 = por %p992_p12, %p991_p5 }
  0x41   : > { %p995_p10 = por %p994_p11, %p993_p1 }
  0x43   : > { %p996_p8 = pnand %p995_p10, %p989_p4 }
  0x45   : > { %999 = shalt.err (!%p996_p8)
}
  0x46   : > { %s1000_s25 = scalar_lea.vmem %s197_s20, 128  ;;  %s1137_s19 = smov [#allocation7]  }
  0x47   : > { %p1001_p6 = scmp.ne.s32.totalorder %s197_s20, %s1000_s25  ;;  %s1005_s23 = sshll.u32 %s1137_s19, 4  ;;  %s1006_s23 = int_to_ptr.vmem [resolvable:$false] %s1005_s23 }
  0x48   : > { %s1007_s27 = scalar_lea.vmem %s1006_s23, 256  ;;  %p1008_p13 = scmp.lt.s32.totalorder %s197_s20, %s1006_s23 }
  0x49   : > { %p1003_p3 = pnand %p1001_p6, %p957_p9  ;;  %p1009_p0 = scmp.lt.s32.totalorder %s1007_s27, %s1000_s25 }
  0x4b   : > { %p1004_p2 = pneg %p1003_p3  ;;  %p1010_p5 = por %p1009_p0, %p1008_p13 }
  0x4d   : > { %p1011_p12 = pnand %p1010_p5, %p1004_p2 }
  0x4f   : > { %1014 = shalt.err (!%p1011_p12)
}
  0x50   : > { %883 = dma.hbm_to_vmem [thread:$0]  (!%p1228_p7), %s1299_s11, 128, %s197_s20, %s1235_s5  }
  0x51   : > { %s1015_s9 = scalar_lea.hbm %s1445_s1, 512  ;;  %p1461_p11 = scmp.ne.s32.totalorder %s1460_s21, 0 }
  0x52   : > { %p1016_p9 = scmp.ne.s32.totalorder %s1445_s1, %s1015_s9  ;;  %p1022_p13 = scmp.lt.u32.totalorder %s1015_s9, %s1445_s1 }
  0x53   : > { %p1017_p6 = pneg %p1461_p11 }
  0x55   : > { %p1018_p8 = pnand %p1017_p6, %p1016_p9 }
  0x57   : > { %p1019_p10 = pneg %p1018_p8 }
  0x59   : > { %p1024_p0 = pnand %p1022_p13, %p1019_p10 }
  0x5b   : > { %1027 = shalt.err (!%p1024_p0)
}
  0x5c   : > { %s1028_s29 = scalar_lea.vmem %s1301_s8, 512  ;;  %p1036_p3 = scmp.lt.s32.totalorder %s1301_s8, %s1301_s8 }
  0x5d   : > { %p1029_p7 = scmp.ne.s32.totalorder %s1301_s8, %s1028_s29  ;;  %p1037_p2 = scmp.lt.s32.totalorder %s1028_s29, %s1028_s29 }
  0x5f   : > { %p1031_p4 = pnand %p1029_p7, %p1017_p6  ;;  %p1038_p5 = por %p1037_p2, %p1036_p3 }
  0x61   : > { %p1032_p1 = pneg %p1031_p4 }
  0x63   : > { %p1039_p12 = pnand %p1038_p5, %p1032_p1 }
  0x65   : > { %1042 = shalt.err (!%p1039_p12)
}
  0x66   : > { %s1138_s0 = smov 128   ;;  %s1139_s5 = smov 8  }
  0x67   : > { %876 = dma.hbm_to_vmem [thread:$0]  (!%p1461_p11), %s1445_s1, 512, %s1301_s8, [#allocation6], %s1138_s0, %s1138_s0, %s1139_s5  }
  0x68   : > { %p1462_p9 = scmp.ne.s32.totalorder %s1459_s6, 0 }
  0x69   : > { %s207_s23 = sand.u32 (!%p1462_p9), 1, %s1264_s26   ;;  %s1357_s27 = sand.u32 (!%p1462_p9), 1, %s1117_s13  }
  0x6a   : > { %205 = sbr.rel (%p1462_p9) target bundleno = 839 (0x347), region = 32  ;;  %s791_s22 = sshll.u32 (!%p1462_p9), %s1357_s27, 3 }
  0x6b   : > { %s208_s7 = scalar_lea.sflag (!%p1462_p9), [#allocation3], %s207_s23  ;;  %s211_s9 = scalar_lea.vmem (!%p1462_p9), [#allocation2], %s791_s22 }
  0x6c   : > { %p1463_p6 = scmp.ne.s32.totalorder (!%p1462_p9), %s1456_s30, 0 }
  0x71   : > { %1096 = dma.done.wait (%p1463_p6), %s208_s7, 128  }
  0x72   : > { %1098 = vsyncadd (%p1463_p6), %s208_s7, 4294967168  ;;  %p1464_p11 = scmp.eq.s32.totalorder %s1264_s26, 0 }
  0x74   : > { %1100 = dma.done.wait (%p1464_p11), [#allocation6], 512   ;;  %p1465_p8 = pmov %p1464_p11 }
  0x75   : > { %s224_s6 = scalar_lea.vmem [#allocation7], %s791_s22 }
  0x76   : > { %1102 = vsyncadd (%p1465_p8), [#allocation6], 4294966784 }
  0x77   : > { %1104 = dma.done.wait (%p1463_p6), %s208_s7, 128  }
  0x78   : > { %1106 = vsyncadd (%p1463_p6), %s208_s7, 4294967168  ;;  %v252_v0 = vld [vmem:[%s211_s9] sm:$0xff]  ;;  %vm255_vm0 = vcmask 261120   ;;  %v269_v3 = vld [vmem:[#allocation5] sm:$0xff]  ;;  %v1140_v6 = vmov 0.0|0.0   ;;  %vm1141_vm1 = vmmov 0  }
  0x79   : > { %v254_v1 = vmul.f32 %v252_v0, %v252_v0  ;;  %v270_v4 = vld [vmem:[#allocation5 + $0x8] sm:$0xff]  ;;  %857 = vmatprep.subr.bf16.mxu0 %v1140_v6  ;;  %v271_v7 = vld [vmem:[#allocation5 + $0x10] sm:$0xff]  ;;  %v272_v8 = vld [vmem:[#allocation5 + $0x18] sm:$0xff]  ;;  %v1142_v10 = vmov 0.0   ;;  %s1143_s26 = smov 32   ;;  %s1144_s30 = smov 96  }
  0x7a   : > { %v858_v5 = vpack.c.bf16 %v270_v4, %v269_v3  ;;  %v861_v9 = vpack.c.bf16 %v272_v8, %v271_v7  ;;  %834 = vmatprep.mubr.msk.f32.mxu0 %vm1141_vm1, %v1142_v10  ;;  %837 = vmatprep.subr.mxu1 %v1142_v10  ;;  %v253_v11 = vld [vmem:[%s224_s6] sm:$0xff]  ;;  %s1145_s8 = smov 64   ;;  %s794_s21 = sshll.u32 %s1357_s27, 5  ;;  %vm422_vm2 = vcmask 64512  }
  0x7b   : > { %v256_v2 = vsel %vm255_vm0, %v254_v1, 0.0  ;;  %839 = vmatprep.mubr.msk.f32.mxu1 %vm1141_vm1, %v1142_v10  ;;  %v261_v12 = vmul.f32 %v253_v11, %v253_v11  ;;  %s251_s10 = scalar_lea.vmem [#allocation8], %s794_s21  ;;  %s812_s19 = sshll.u32 %s1125_s15, 9 }
  0x7c   : > { %257 = vadd.xlane.f32.xlu0 %v256_v2  ;;  %859 = vmatpush3.bf16.msra.mxu0 %v858_v5  ;;  %s667_s25 = sshll.u32 %s251_s10, 4  ;;  %s1395_s5 = scalar_lea.hbm %s1447_s3, %s812_s19  ;;  %s1390_s25 = int_to_ptr.vmem [resolvable:$true] %s667_s25 }
  0x7d   : > { %860 = vmatprep.subr.bf16.mxu0 %v1140_v6  ;;  %v262_v13 = vsel %vm255_vm0, %v261_v12, 0.0  ;;  %s653_s15 = scalar_lea.sflag [#allocation4], %s1357_s27  ;;  %s1043_s11 = scalar_lea.vmem %s1390_s25, 512 }
  0x7e   : > { %p1044_p10 = scmp.ne.s32.totalorder %s1390_s25, %s1043_s11  ;;  %p1466_p13 = scmp.ne.s32.totalorder %s1457_s28, 0 }
  0x7f   : > { %s1146_s20 = smov [#allocation8]  }
  0x80   : > { %862 = vmatpush3.bf16.msra.mxu0 %v861_v9  ;;  %263 = vadd.xlane.f32.xlu0 %v262_v13  ;;  %p1045_p0 = pnand %p1044_p10, %p1466_p13  ;;  %s1047_s23 = sshll.u32 %s1146_s20, 4  ;;  %s1048_s23 = int_to_ptr.vmem [resolvable:$false] %s1047_s23 }
  0x81   : > { %847 = vmatprep.subr.mxu0 %v1142_v10  ;;  %s1049_s22 = scalar_lea.vmem %s1048_s23, 1024  ;;  %p1050_p4 = scmp.lt.s32.totalorder %s1390_s25, %s1048_s23 }
  0x82   : > { %p1046_p7 = pneg %p1045_p0  ;;  %p1051_p1 = scmp.lt.s32.totalorder %s1049_s22, %s1043_s11 }
  0x84   : > { %p1052_p3 = por %p1051_p1, %p1050_p4 }
  0x86   : > { %p1053_p2 = pnand %p1052_p3, %p1046_p7 }
 0x109   : > { %v258_v14 = vpop.xlane.xlu0 %257 }
 0x10a   : > { %951 = vrsqrt.f32 %v258_v14 }
 0x10d   : > { %v264_v18 = vpop.xlane.xlu0 %263 }
 0x10e   : > { %953 = vrsqrt.f32 %v264_v18 }
 0x114   : > { %v952_v15 = vpop.eup %951 }
 0x115   : > { %v260_v16 = vmin.f32 %v952_v15, 1e+12 }
 0x117   : > { %v267_v17 = vmul.f32 %v260_v16, %v252_v0 }
 0x118   : > { %v954_v19 = vpop.eup %953 }
 0x119   : > { %835 = vmatmul.mubr.msk.f32.vlgmr.msra.gmra.mrb[0].mxu0 %vm255_vm0, %v267_v17  ;;  %v266_v20 = vmin.f32 %v954_v19, 1e+12 }
 0x11a   : > { %849 = vmatprep.mubr.msk.f32.mxu0 %vm1141_vm1, %v1142_v10 }
 0x11b   : > { %v268_v21 = vmul.f32 %v266_v20, %v253_v11 }
 0x11d   : > { %838 = vmatpush3.xpose.msk.msra.mxu1 %vm255_vm0, %v268_v21  ;;  %848 = vmatpush3.xpose.msk.msra.mxu0 %vm255_vm0, %v268_v21 }
 0x11e   : > { %842 = vmatprep.subr.mxu1 %v1142_v10 }
 0x1ec   : > { %v342_v22 = vpop.f32.mrb[0].mxu0 }
 0x1ed   : > { %576 = vrot.lane.b32.xlu0 %v342_v22, %s1143_s26  ;;  %424 = vrot.lane.b32.xlu1 %v342_v22, %s1144_s30  ;;  %v836_v23 = vpop.f32.mrb[1].mxu0 }
 0x1ee   : > { %840 = vmatmul.mubr.msk.f32.vlgmr.msra.gmra.mrb[0].mxu1 %vm255_vm0, %v342_v22 }
 0x1ef   : > { %843 = vmatpush3.xpose.msk.msra.mxu1 %vm255_vm0, %v268_v21  ;;  %844 = vmatprep.mubr.msk.f32.mxu1 %vm1141_vm1, %v1142_v10 }
 0x1f0   : > { %852 = vmatprep.subr.mxu1 %v1142_v10 }
 0x1f1   : > { %500 = vrot.lane.b32.xlu1 %v342_v22, %s1145_s8 }
 0x25f   : > { %v425_v24 = vpop.permute.xlu1 %424  ;;  %v577_v25 = vpop.permute.xlu0 %576 }
 0x260   : > { %845 = vmatmul.mubr.msk.f32.vlgmr.msra.gmra.mrb[2].mxu1 %vm255_vm0, %v425_v24 }
 0x261   : > { %853 = vmatpush3.xpose.msk.msra.mxu1 %vm255_vm0, %v268_v21  ;;  %854 = vmatprep.mubr.msk.f32.mxu1 %vm1141_vm1, %v1142_v10 }
 0x263   : > { %v501_v26 = vpop.permute.xlu1 %500 }
 0x264   : > { %850 = vmatmul.mubr.msk.f32.vlgmr.msra.gmra.mrb[2].mxu0 %vm255_vm0, %v501_v26  ;;  %855 = vmatmul.mubr.msk.f32.vlgmr.msra.gmra.mrb[4].mxu1 %vm255_vm0, %v577_v25 }
 0x2c1   : > { %v418_v27 = vpop.f32.mrb[0].mxu1 }
 0x2c2   : > { %423 = vst.msk [vmem:[%s251_s10] sm:$0xff] %vm422_vm2, %v418_v27  ;;  %v841_v28 = vpop.f32.mrb[1].mxu1 }
 0x333   : > { %v494_v29 = vpop.f32.mrb[2].mxu1 }
 0x334   : > { %800 = vst.msk [vmem:[%s251_s10 + $0x8] sm:$0xff] %vm422_vm2, %v494_v29  ;;  %v846_v30 = vpop.f32.mrb[3].mxu1 }
 0x337   : > { %v570_v31 = vpop.f32.mrb[2].mxu0  ;;  %v646_v32 = vpop.f32.mrb[4].mxu1 }
 0x338   : > { %803 = vst.msk [vmem:[%s251_s10 + $0x10] sm:$0xff] %vm422_vm2, %v570_v31  ;;  %806 = vst.msk [vmem:[%s251_s10 + $0x18] sm:$0xff] %vm422_vm2, %v646_v32  ;;  %v851_v33 = vpop.f32.mrb[3].mxu0  ;;  %v856_v34 = vpop.f32.mrb[5].mxu1 }
 0x339   : > { %1056 = shalt.err (!%p1053_p2)
}
 0x33a   : > { %s1057_s7 = scalar_lea.hbm %s1395_s5, 512  ;;  %s1061_s26 = scalar_lea.hbm %s1447_s3, 1024 }
 0x33b   : > { %p1058_p5 = scmp.ne.s32.totalorder %s1395_s5, %s1057_s7  ;;  %p1062_p6 = scmp.lt.u32.totalorder %s1395_s5, %s1447_s3 }
 0x33c   : > { %p1063_p11 = scmp.lt.u32.totalorder %s1061_s26, %s1057_s7  ;;  %p1065_p10 = scmp.lt.u32.totalorder %s1057_s7, %s1395_s5 }
 0x33d   : > { %p1059_p12 = pnand %p1058_p5, %p1466_p13 }
 0x33e   : > { %p1064_p8 = por %p1063_p11, %p1062_p6 }
 0x33f   : > { %p1060_p9 = pneg %p1059_p12 }
 0x340   : > { %p1066_p0 = por %p1065_p10, %p1064_p8 }
 0x342   : > { %p1067_p7 = pnand %p1066_p0, %p1060_p9 }
 0x344   : > { %1070 = shalt.err (!%p1067_p7)
}
 0x345   : > { %s1147_s21 = smov 128   ;;  %s1148_s10 = smov 8  }
 0x346   : > { %871 = dma.vmem_to_hbm [thread:$0]  (%p1466_p13), %s1390_s25, 512, %s1395_s5, %s653_s15, %s1147_s21, %s1147_s21, %s1148_s10  }
 0x347 PF: > { %s682_s19 = sand.u32 1, %s1113_s12   ;;  %p1467_p4 = scmp.ne.s32.totalorder %s1458_s4, 0 }
 0x348   : > { %p1468_p1 = scmp.ge.s32.totalorder %s1133_s17, 2  ;;  %s683_s29 = scalar_lea.sflag [#allocation4], %s682_s19 }
 0x34a   : > { %p885_p3 = pnand %p1468_p1, %p1467_p4 }
 0x34c   : > { %1108 = dma.done.wait (!%p885_p3), %s683_s29, 512  }
 0x34d   : > { %1110 = vsyncadd (!%p885_p3), %s683_s29, 4294966784  ;;  %s20_s17 = sadd.s32 1, %s1133_s17   ;;  %s1469_s12 = smov %s1117_s13 }
 0x34e   : > { %p17_p2 = scmp.ge.s32.totalorder %s20_s17, 4   ;;  %s1470_s13 = smov %s1121_s14 }
 0x34f   : > { %s1471_s14 = smov %s1217_s24  ;;  %s1472_s15 = smov %s1129_s16 }
 0x350   : > { %s1473_s16 = smov %s1475_s18  ;;  %19 = sbr.rel (!%p17_p2) target bundleno = 9 (0x9), region = 95 }
 0x357   :  { %688 = vsyncpa [#allocation3], 1 }
 0x358   :  { %690 = vsyncpa [#allocation3 + $0x1], 1 }
 0x359   :  { %691 = vsyncpa [#allocation6], 1 }
 0x35a   :  { %692 = vsyncpa [#allocation4], 1 }
 0x35b   :  { %694 = vsyncpa [#allocation4 + $0x1], 1 }

</bundles_post_ra>
